<compile_context>
chip_gen: v7x
topology: tpu7x:2x2x1
jax: 0.10.0
libtpu: 0.0.40
codegen_flags: <defaults>
</compile_context>

<pallas_src>
import functools

import numpy as np
import jax
import jax.numpy as jnp
from jax.experimental import pallas as pl
from jax.experimental.pallas import tpu as pltpu

TOKEN_SELF_ATTN_VALUE = -50000.0


def _full_qk_attention_kernel(q_ref, qk_ref, v_ref, o_ref, attn_ref, *,
                              scale, query_len, causal, masked_value):
    # Per grid step:
    #   q_ref    : (1, block_q, dim)
    #   qk_ref   : (1, seq, dim)   (resident across the q-block grid axis)
    #   v_ref    : (1, seq, dim)
    #   o_ref    : (1, block_q, dim)
    #   attn_ref : (1, block_q, seq)
    compute_dtype = qk_ref.dtype

    # F.normalize(qk, 2, -1): x / max(||x||, 1e-12) == x * rsqrt(max(||x||^2, 1e-24))
    kq_f32 = qk_ref[0].astype(jnp.float32)                      # (s, d)
    sq = jnp.sum(kq_f32 * kq_f32, axis=-1, keepdims=True)
    kq_n = (kq_f32 * jax.lax.rsqrt(jnp.maximum(sq, 1e-24))).astype(compute_dtype)

    # Fold dim**-0.5 into q (one multiply on the small q tile).
    q = (q_ref[0].astype(jnp.float32) * scale).astype(compute_dtype)   # (bq, d)

    # "q @ k^T" contraction expressed directly as dot_general (no transpose op);
    # operands in the input dtype, f32 accumulation on the MXU.
    dot = jax.lax.dot_general(q, kq_n,
                              (((1,), (1,)), ((), ())),
                              preferred_element_type=jnp.float32)       # (bq, s)

    bq, s = dot.shape
    row = pl.program_id(1) * bq + jax.lax.broadcasted_iota(jnp.int32, (bq, s), 0)
    col = jax.lax.broadcasted_iota(jnp.int32, (bq, s), 1)

    # dot[:, i, i] = TOKEN_SELF_ATTN_VALUE  (token never attends to itself)
    dot = jnp.where(row == col, TOKEN_SELF_ATTN_VALUE, dot)
    if causal:
        # torch uses triu_indices(t, t, 1): only the first query_len key columns
        dot = jnp.where((col > row) & (col < query_len), masked_value, dot)

    # Numerically-stable softmax along the key axis (EUP exp + approx reciprocal).
    m = jnp.max(dot, axis=-1, keepdims=True)
    p = jnp.exp(dot - m)
    l = jnp.sum(p, axis=-1, keepdims=True)
    attn = p * pl.reciprocal(l, approx=True)

    # attn @ v with operands in v's dtype (fewer MXU passes for bf16), f32 acc.
    out = jnp.dot(attn.astype(v_ref.dtype), v_ref[0],
                  preferred_element_type=jnp.float32)                   # (bq, d)

    o_ref[0] = out.astype(o_ref.dtype)
    attn_ref[0] = attn.astype(attn_ref.dtype)


def _choose_block_q(t, s, d, itemsize, vmem_limit_bytes):
    """Largest divisor of t whose per-step VMEM footprint fits the budget."""
    budget = int(vmem_limit_bytes * 0.6)
    kv_bytes = 2 * 2 * s * d * itemsize                 # double-buffered keys+values
    candidates = [t] + [c for c in (2048, 1024, 512, 256, 128, 64, 32, 16, 8)
                        if c < t]
    chosen = None
    for bq in candidates:
        if t % bq != 0:
            continue
        if chosen is None:
            chosen = bq                                  # fallback: smallest divisor seen
        per_step = (kv_bytes
                    + 2 * bq * (2 * d + s) * itemsize    # q, out, attn tiles (dbl-buf)
                    + 3 * bq * s * 4)                    # f32 score/exp intermediates
        if per_step <= budget:
            return bq
        chosen = bq
    return chosen if chosen is not None else t


def full_qk_attention(qk, v, *, query_len=None, causal=False, block_q=None,
                      vmem_limit_bytes=48 * 1024 * 1024):
    """Pallas TPU FullQKAttention.forward (dropout=0.0, no input masks).

    Returns (out, attention_matrix, empty) like the PyTorch module.
    """
    # TODO(synk): nn.Dropout on the attention matrix (p>0) not implemented.
    # TODO(synk): input_mask / input_attn_mask boolean masking not implemented
    #             (module defaults are None).
    b, s, d = qk.shape
    t = s if query_len is None else int(query_len)
    q = qk[:, :t]                       # static slice of the queries

    itemsize = jnp.dtype(qk.dtype).itemsize
    if block_q is None:
        block_q = _choose_block_q(t, s, d, itemsize, vmem_limit_bytes)
    assert t % block_q == 0, "query_len must be divisible by block_q"
    num_q = t // block_q

    scale = float(d) ** -0.5
    masked_value = -float(np.finfo(np.float32).max)

    kernel = functools.partial(
        _full_qk_attention_kernel,
        scale=scale, query_len=t, causal=causal, masked_value=masked_value)

    out, attn = pl.pallas_call(
        kernel,
        out_shape=(
            jax.ShapeDtypeStruct((b, t, d), qk.dtype),
            jax.ShapeDtypeStruct((b, t, s), qk.dtype),
        ),
        grid=(b, num_q),
        in_specs=[
            pl.BlockSpec((1, block_q, d), lambda bi, qi: (bi, qi, 0)),   # q tile
            pl.BlockSpec((1, s, d), lambda bi, qi: (bi, 0, 0)),          # full keys
            pl.BlockSpec((1, s, d), lambda bi, qi: (bi, 0, 0)),          # full values
        ],
        out_specs=(
            pl.BlockSpec((1, block_q, d), lambda bi, qi: (bi, qi, 0)),   # out
            pl.BlockSpec((1, block_q, s), lambda bi, qi: (bi, qi, 0)),   # attn
        ),
        compiler_params=pltpu.CompilerParams(
            dimension_semantics=("parallel", "parallel"),
            vmem_limit_bytes=vmem_limit_bytes,
        ),
    )(q, qk, v)

    return out, attn, jnp.zeros((0,), dtype=qk.dtype)


if __name__ == "__main__":
    key = jax.random.PRNGKey(0)
    batch, seq_len, dim = 2, 8, 32
    k1, k2 = jax.random.split(key)
    qk = jax.random.normal(k1, (batch, seq_len, dim), dtype=jnp.float32)
    v = jax.random.normal(k2, (batch, seq_len, dim), dtype=jnp.float32)

    out, attn, buckets = full_qk_attention(qk, v)
    out = jax.block_until_ready(out)
    attn = jax.block_until_ready(attn)

    # float64 numpy reference of the PyTorch forward (causal=False, dropout=0).
    qk64 = np.asarray(qk, dtype=np.float64)
    v64 = np.asarray(v, dtype=np.float64)
    t = seq_len
    q64 = qk64[:, :t]
    n = np.maximum(np.linalg.norm(qk64, axis=-1, keepdims=True), 1e-12)
    qk_n = qk64 / n
    dot = np.einsum('bie,bje->bij', q64, qk_n) * dim ** (-0.5)
    idx = np.arange(t)
    dot[:, idx, idx] = TOKEN_SELF_ATTN_VALUE
    dot = dot - dot.max(axis=-1, keepdims=True)
    e = np.exp(dot)
    attn_ref = e / e.sum(axis=-1, keepdims=True)
    out_ref = np.einsum('bij,bje->bie', attn_ref, v64)

    assert out.shape == (batch, t, dim)
    assert attn.shape == (batch, t, seq_len)
    assert buckets.shape == (0,)
    # Tolerance covers MXU default-precision f32 matmul passes + approx reciprocal.
    assert np.allclose(np.asarray(out), out_ref, atol=5e-2, rtol=5e-2), "out mismatch"
    assert np.allclose(np.asarray(attn), attn_ref, atol=5e-2, rtol=5e-2), "attn mismatch"

    print("KERNEL_OK")
</pallas_src>

<mosaic_0001>
module attributes {stable_mosaic.version = 11 : i64} {
  func.func @_full_qk_attention_kernel(%arg0: i32, %arg1: i32, %arg2: memref<1x8x32xf32, #tpu.memory_space<vmem>>, %arg3: memref<1x8x32xf32, #tpu.memory_space<vmem>>, %arg4: memref<1x8x32xf32, #tpu.memory_space<vmem>>, %arg5: memref<1x8x32xf32, #tpu.memory_space<vmem>>, %arg6: memref<1x8x8xf32, #tpu.memory_space<vmem>>) attributes {dimension_semantics = [#tpu.dimension_semantics<parallel>, #tpu.dimension_semantics<parallel>], iteration_bounds = array<i64: 2, 1>, scalar_prefetch = 0 : i64, scratch_operands = 0 : i64, tpu.core_type = #tpu.core_type<tc>, window_params = [{transform_indices = @transform_0, window_bounds = array<i64: 1, 8, 32>}, {transform_indices = @transform_1, window_bounds = array<i64: 1, 8, 32>}, {transform_indices = @transform_2, window_bounds = array<i64: 1, 8, 32>}, {transform_indices = @transform_3, window_bounds = array<i64: 1, 8, 32>}, {transform_indices = @transform_4, window_bounds = array<i64: 1, 8, 8>}]} {
    %c0 = arith.constant 0 : index
    %c0_0 = arith.constant 0 : index
    %c0_1 = arith.constant 0 : index
    %0 = vector.load %arg3[%c0, %c0_0, %c0_1] : memref<1x8x32xf32, #tpu.memory_space<vmem>>, vector<1x8x32xf32>
    %1 = vector.shape_cast %0 : vector<1x8x32xf32> to vector<8x32xf32>
    %2 = arith.mulf %1, %1 : vector<8x32xf32>
    %cst = arith.constant dense<0.000000e+00> : vector<8xf32>
    %3 = vector.multi_reduction <add>, %2, %cst [1] : vector<8x32xf32> to vector<8xf32>
    %4 = vector.shape_cast %3 : vector<8xf32> to vector<8x1xf32>
    %cst_2 = arith.constant 1.000000e-24 : f32
    %5 = vector.broadcast %cst_2 : f32 to vector<8x1xf32>
    %6 = arith.maximumf %4, %5 : vector<8x1xf32>
    %7 = math.rsqrt %6 : vector<8x1xf32>
    %8 = vector.broadcast %7 : vector<8x1xf32> to vector<8x32xf32>
    %9 = arith.mulf %1, %8 : vector<8x32xf32>
    %c0_3 = arith.constant 0 : index
    %c0_4 = arith.constant 0 : index
    %c0_5 = arith.constant 0 : index
    %10 = vector.load %arg2[%c0_3, %c0_4, %c0_5] : memref<1x8x32xf32, #tpu.memory_space<vmem>>, vector<1x8x32xf32>
    %11 = vector.shape_cast %10 : vector<1x8x32xf32> to vector<8x32xf32>
    %cst_6 = arith.constant 0.176776692 : f32
    %12 = vector.broadcast %cst_6 : f32 to vector<8x32xf32>
    %13 = arith.mulf %11, %12 : vector<8x32xf32>
    %cst_7 = arith.constant dense<0.000000e+00> : vector<8x8xf32>
    %14 = tpu.matmul %13, %9, %cst_7 {dimension_numbers = #tpu.dot_dimension_numbers<[1], [1], [0], [0], [0, 0, 1, 0], [], []>} : vector<8x32xf32>, vector<8x32xf32>, vector<8x8xf32> -> vector<8x8xf32>
    %c8_i32 = arith.constant 8 : i32
    %15 = arith.muli %arg1, %c8_i32 : i32
    %16 = tpu.iota {dimensions = array<i32: 0>} : vector<8x8xi32>
    %17 = vector.broadcast %15 : i32 to vector<8x8xi32>
    %18 = arith.addi %17, %16 : vector<8x8xi32>
    %19 = tpu.iota {dimensions = array<i32: 1>} : vector<8x8xi32>
    %20 = arith.cmpi eq, %18, %19 : vector<8x8xi32>
    %cst_8 = arith.constant -5.000000e+04 : f32
    %21 = vector.broadcast %cst_8 : f32 to vector<8x8xf32>
    %22 = arith.select %20, %21, %14 : vector<8x8xi1>, vector<8x8xf32>
    %cst_9 = arith.constant dense<0xFF800000> : vector<8xf32>
    %23 = vector.multi_reduction <maximumf>, %22, %cst_9 [1] : vector<8x8xf32> to vector<8xf32>
    %24 = vector.shape_cast %23 : vector<8xf32> to vector<8x1xf32>
    %25 = vector.broadcast %24 : vector<8x1xf32> to vector<8x8xf32>
    %26 = arith.subf %22, %25 : vector<8x8xf32>
    %27 = math.exp %26 : vector<8x8xf32>
    %cst_10 = arith.constant dense<0.000000e+00> : vector<8xf32>
    %28 = vector.multi_reduction <add>, %27, %cst_10 [1] : vector<8x8xf32> to vector<8xf32>
    %29 = vector.shape_cast %28 : vector<8xf32> to vector<8x1xf32>
    %30 = tpu.reciprocal %29 {approx = true} : vector<8x1xf32> -> vector<8x1xf32>
    %31 = vector.broadcast %30 : vector<8x1xf32> to vector<8x8xf32>
    %32 = arith.mulf %27, %31 : vector<8x8xf32>
    %c0_11 = arith.constant 0 : index
    %c0_12 = arith.constant 0 : index
    %c0_13 = arith.constant 0 : index
    %33 = vector.load %arg4[%c0_11, %c0_12, %c0_13] : memref<1x8x32xf32, #tpu.memory_space<vmem>>, vector<1x8x32xf32>
    %34 = vector.shape_cast %33 : vector<1x8x32xf32> to vector<8x32xf32>
    %cst_14 = arith.constant dense<0.000000e+00> : vector<8x32xf32>
    %35 = tpu.matmul %32, %34, %cst_14 {dimension_numbers = #tpu.dot_dimension_numbers<[1], [0], [0], [1], [0, 0, 1, 1], [], []>} : vector<8x8xf32>, vector<8x32xf32>, vector<8x32xf32> -> vector<8x32xf32>
    %c0_15 = arith.constant 0 : index
    %c0_16 = arith.constant 0 : index
    %c0_17 = arith.constant 0 : index
    %36 = vector.load %arg5[%c0_15, %c0_16, %c0_17] : memref<1x8x32xf32, #tpu.memory_space<vmem>>, vector<1x8x32xf32>
    %37 = vector.shape_cast %36 : vector<1x8x32xf32> to vector<8x32xf32>
    %38 = vector.shape_cast %35 : vector<8x32xf32> to vector<1x8x32xf32>
    tpu.vector_store %arg5[%c0_15, %c0_16, %c0_17], %38 {strides = array<i32>} : memref<1x8x32xf32, #tpu.memory_space<vmem>>, vector<1x8x32xf32>,
    %c0_18 = arith.constant 0 : index
    %c0_19 = arith.constant 0 : index
    %c0_20 = arith.constant 0 : index
    %39 = vector.load %arg6[%c0_18, %c0_19, %c0_20] : memref<1x8x8xf32, #tpu.memory_space<vmem>>, vector<1x8x8xf32>
    %40 = vector.shape_cast %39 : vector<1x8x8xf32> to vector<8x8xf32>
    %41 = vector.shape_cast %32 : vector<8x8xf32> to vector<1x8x8xf32>
    tpu.vector_store %arg6[%c0_18, %c0_19, %c0_20], %41 {strides = array<i32>} : memref<1x8x8xf32, #tpu.memory_space<vmem>>, vector<1x8x8xf32>,
    return
  }
  func.func @transform_0(%arg0: i32, %arg1: i32) -> (i32, i32, i32) {
    %c0_i32 = arith.constant 0 : i32
    %c0_i32_0 = arith.constant 0 : i32
    return %arg0, %arg1, %c0_i32 : i32, i32, i32
  }
  func.func @transform_1(%arg0: i32, %arg1: i32) -> (i32, i32, i32) {
    %c0_i32 = arith.constant 0 : i32
    %c0_i32_0 = arith.constant 0 : i32
    %c0_i32_1 = arith.constant 0 : i32
    return %arg0, %c0_i32, %c0_i32_0 : i32, i32, i32
  }
  func.func @transform_2(%arg0: i32, %arg1: i32) -> (i32, i32, i32) {
    %c0_i32 = arith.constant 0 : i32
    %c0_i32_0 = arith.constant 0 : i32
    %c0_i32_1 = arith.constant 0 : i32
    return %arg0, %c0_i32, %c0_i32_0 : i32, i32, i32
  }
  func.func @transform_3(%arg0: i32, %arg1: i32) -> (i32, i32, i32) {
    %c0_i32 = arith.constant 0 : i32
    %c0_i32_0 = arith.constant 0 : i32
    return %arg0, %arg1, %c0_i32 : i32, i32, i32
  }
  func.func @transform_4(%arg0: i32, %arg1: i32) -> (i32, i32, i32) {
    %c0_i32 = arith.constant 0 : i32
    %c0_i32_0 = arith.constant 0 : i32
    return %arg0, %arg1, %c0_i32 : i32, i32, i32
  }
}

</mosaic_0001>

<bundles_post_ra>
// kernel: tpu_custom_call.1
= control target key start
LH: loop header
LB: loop body
LE: loop exit
PB: predicated region body
PF: predicated region fallthrough
CT: control target
= control target key end

     0   :  { %s1354_s0 = inlined_call_operand.hbm [shape: f32[2,8,32], index: 0, kind: input, shape index: {}]   ;;  %s1355_s1 = inlined_call_operand.hbm [shape: f32[2,8,32], index: 1, kind: input, shape index: {}]   ;;  %s1356_s2 = inlined_call_operand.hbm [shape: f32[2,8,32], index: 2, kind: input, shape index: {}]   ;;  %s1357_s3 = inlined_call_operand.hbm [shape: f32[2,8,32], index: 3, kind: output, shape index: {0}]   ;;  %s1358_s4 = inlined_call_operand.hbm [shape: f32[2,8,8], index: 4, kind: output, shape index: {1}]  }
   0x1   :  { %1367 = sst [smem:[#allocation19_spill]] %s1355_s1 }
   0x2   :  { %10 = vsyncpa [#allocation3], 0 }
   0x3   :  { %12 = vsyncpa [#allocation3 + $0x1], 0 }
   0x4   :  { %13 = vsyncpa [#allocation6], 0 }
   0x5   :  { %15 = vsyncpa [#allocation6 + $0x1], 0 }
   0x6   :  { %16 = vsyncpa [#allocation4], 0 }
   0x7   :  { %18 = vsyncpa [#allocation4 + $0x1], 0 }
   0x8   :  { %19 = vsyncpa [#allocation10], 0 }
   0x9   :  { %21 = vsyncpa [#allocation10 + $0x1], 0  ;;  %s1054_s15 = smov 0   ;;  %s1056_s16 = smov 0  }
   0xa   :  { %s1058_s17 = smov 0   ;;  %s1060_s18 = smov 0  }
   0xb   :  { %s1062_s19 = smov 0   ;;  %s1064_s20 = smov 0  }
   0xc LB: > { %1368 = sst [smem:[#allocation15_spill]] %s1016_s19  ;;  %s1085_s21 = sadd.s32 4294967295, %s1020_s20   ;;  %s1020_s20 = sphi %s1064_s20, %s27_s20   ;;  %s1016_s19 = sphi %s1062_s19, %s1392_s19   ;;  %s1012_s18 = sphi %s1060_s18, %s1391_s18   ;;  %s1008_s17 = sphi %s1058_s17, %s1395_s17   ;;  %s1004_s16 = sphi %s1056_s16, %s1394_s16   ;;  %s1000_s15 = sphi %s1054_s15, %s1393_s15  }
   0xd   : > { %1369 = sst [smem:[#allocation16_spill]] %s1020_s20  ;;  %s689_s22 = sadd.s32 4294967294, %s1020_s20  }
   0xe   : > { %s39_s23 = sadd.s32 1, %s1016_s19  ;;  %s48_s24 = sadd.s32 1, %s1008_s17 }
   0xf   : > { %p41_p0 = scmp.ge.s32.totalorder %s39_s23, 2  ;;  %p55_p1 = scmp.ne.s32.totalorder %s1008_s17, %s1004_s16 }
  0x10   : > { %p56_p2 = scmp.eq.s32.totalorder %s1020_s20, 0  ;;  %p61_p3 = scmp.ne.s32.totalorder %s1004_s16, %s1000_s15 }
  0x11   : > { %s1397_s23 = smov (%p41_p0, %s39_s23), 0  ;;  %p62_p5 = scmp.eq.s32.totalorder %s1085_s21, 0 }
  0x12   : > { %1370 = sst [smem:[#allocation17_spill]] %s1397_s23  ;;  %p1097_p4 = por %p56_p2, %p55_p1 }
  0x13   : > { %s43_s26 = ssub.s32 %s1016_s19, %s1397_s23  ;;  %p139_p6 = scmp.eq.s32.totalorder %s1085_s21, 1 }
  0x14   : > { %p46_p7 = scmp.eq.s32.totalorder %s43_s26, 0  ;;  %p1105_p8 = por %p62_p5, %p61_p3 }
  0x15   : > { %p1109_p9 = por %p139_p6, %p55_p1  ;;  %p145_p10 = scmp.eq.s32.totalorder %s689_s22, 1 }
  0x16   : > { %s1372_s27 = scalar_select %p1105_p8, 1, 0 }
  0x17   : > { %s1373_s28 = scalar_select %p1109_p9, 1, 0 }
  0x18   : > { %s1114_s29 = scalar_select %p46_p7, %s1008_s17, %s48_s24  }
  0x19   : > { %p1116_p11 = por %p145_p10, %p61_p3  ;;  %p754_p13 = scmp.lt.s32.totalorder %s1020_s20, 2 }
  0x1a   : > { %1374 = sst [smem:[#allocation18_spill]] %s1114_s29  ;;  %s1359_s5 = sand.u32 1, %s1008_s17  }
  0x1b   : > { %s1375_s30 = scalar_select %p1116_p11, 1, 0 }
  0x1c   : > { %s1125_s6 = sshll.u32 %s1359_s5, 3  ;;  %s1128_s7 = sshll.u32 %s1016_s19, 7 }
  0x1d   : > { %p1132_p0 = pnand %p754_p13, %p1097_p4  ;;  %s212_s9 = sand.u32 1, %s1020_s20  }
  0x1e   : > { %s1377_s1 = sld [smem:[#allocation19_spill]]  ;;  %s216_s13 = scalar_lea.vmem [#allocation5], %s1125_s6 }
  0x1f   : > { %s1376_s8 = scalar_select %p1132_p0, 1, 0 }
  0x20   : > { %s223_s14 = sshll.u32 %s216_s13, 4  ;;  %s1148_s22 = scalar_lea.sflag [#allocation6], %s212_s9  ;;  %s1145_s14 = int_to_ptr.vmem [resolvable:$true] %s223_s14 }
  0x21   : > { %p1154_p4 = pneg %p1132_p0 }
  0x24   : > { %s1141_s12 = scalar_lea.hbm %s1377_s1, %s1128_s7  ;;  %s817_s11 = scalar_lea.hbm %s1377_s1, 256 }
  0x25   : > { %s812_s24 = scalar_lea.hbm %s1141_s12, 128  ;;  %p818_p7 = scmp.lt.u32.totalorder %s1141_s12, %s1377_s1 }
  0x26   : > { %p813_p3 = scmp.ne.s32.totalorder %s1141_s12, %s812_s24  ;;  %p819_p10 = scmp.lt.u32.totalorder %s817_s11, %s812_s24 }
  0x27   : > { %p821_p12 = scmp.lt.u32.totalorder %s812_s24, %s1141_s12 }
  0x28   : > { %p815_p5 = pnand %p1154_p4, %p813_p3  ;;  %p820_p13 = por %p819_p10, %p818_p7 }
  0x2a   : > { %p816_p6 = pneg %p815_p5  ;;  %p822_p1 = por %p821_p12, %p820_p13 }
  0x2c   : > { %p823_p2 = pnand %p822_p1, %p816_p6 }
  0x2e   : > { %826 = shalt.err (!%p823_p2)
}
  0x2f   : > { %s827_s9 = scalar_lea.vmem %s1145_s14, 128  ;;  %s1022_s26 = smov [#allocation5]  }
  0x30   : > { %p828_p3 = scmp.ne.s32.totalorder %s1145_s14, %s827_s9  ;;  %s832_s10 = sshll.u32 %s1022_s26, 4  ;;  %s833_s10 = int_to_ptr.vmem [resolvable:$false] %s832_s10 }
  0x31   : > { %s834_s5 = scalar_lea.vmem %s833_s10, 256  ;;  %p835_p9 = scmp.lt.s32.totalorder %s1145_s14, %s833_s10 }
  0x32   : > { %p830_p5 = pnand %p828_p3, %p1154_p4  ;;  %p836_p8 = scmp.lt.s32.totalorder %s834_s5, %s827_s9 }
  0x34   : > { %p831_p11 = pneg %p830_p5  ;;  %p837_p7 = por %p836_p8, %p835_p9 }
  0x36   : > { %p838_p10 = pnand %p837_p7, %p831_p11 }
  0x38   : > { %841 = shalt.err (!%p838_p10)
}
  0x39   : > { %743 = dma.hbm_to_vmem [thread:$0]  (!%p1132_p0), %s1141_s12, 128, %s1145_s14, %s1148_s22  }
  0x3a   : > { %p1379_p12 = scmp.lt.s32.totalorder %s1020_s20, 3  ;;  %p1380_p1 = scmp.ge.s32.totalorder %s1020_s20, 1 }
  0x3b   : > { %s1190_s9 = scalar_lea.hbm %s1354_s0, %s1128_s7  ;;  %s197_s26 = scalar_lea.vmem [#allocation2], %s1125_s6 }
  0x3c   : > { %p1182_p2 = pnand %p1380_p1, %p1379_p12  ;;  %s205_s10 = sshll.u32 %s197_s26, 4  ;;  %s1193_s10 = int_to_ptr.vmem [resolvable:$true] %s205_s10 }
  0x3d   : > { %s1199_s5 = scalar_lea.hbm %s1356_s2, %s1128_s7  ;;  %s1382_s1 = sand.u32 1, %s1008_s17  }
  0x3e   : > { %s1381_s24 = scalar_select %p1182_p2, 1, 0 }
  0x3f   : > { %s194_s23 = scalar_lea.sflag [#allocation3], %s1382_s1  ;;  %s842_s19 = scalar_lea.hbm %s1190_s9, 128 }
  0x40   : > { %p843_p8 = scmp.ne.s32.totalorder %s1190_s9, %s842_s19  ;;  %s847_s29 = scalar_lea.hbm %s1354_s0, 256 }
  0x41   : > { %p848_p6 = scmp.lt.u32.totalorder %s1190_s9, %s1354_s0  ;;  %p849_p13 = scmp.lt.u32.totalorder %s847_s29, %s842_s19 }
  0x42   : > { %p845_p9 = pnand %p843_p8, %p1154_p4  ;;  %p851_p5 = scmp.lt.u32.totalorder %s842_s19, %s1190_s9 }
  0x43   : > { %p850_p3 = por %p849_p13, %p848_p6 }
  0x44   : > { %p846_p11 = pneg %p845_p9 }
  0x45   : > { %p852_p7 = por %p851_p5, %p850_p3 }
  0x47   : > { %p853_p10 = pnand %p852_p7, %p846_p11 }
  0x49   : > { %856 = shalt.err (!%p853_p10)
}
  0x4a   : > { %s857_s1 = scalar_lea.vmem %s1193_s10, 128  ;;  %s1023_s7 = smov [#allocation2]  }
  0x4b   : > { %p858_p12 = scmp.ne.s32.totalorder %s1193_s10, %s857_s1  ;;  %s862_s12 = sshll.u32 %s1023_s7, 4  ;;  %s863_s12 = int_to_ptr.vmem [resolvable:$false] %s862_s12 }
  0x4c   : > { %s864_s20 = scalar_lea.vmem %s863_s12, 256  ;;  %p865_p9 = scmp.lt.s32.totalorder %s1193_s10, %s863_s12 }
  0x4d   : > { %p860_p1 = pnand %p858_p12, %p1154_p4  ;;  %p866_p2 = scmp.lt.s32.totalorder %s864_s20, %s857_s1 }
  0x4f   : > { %p861_p8 = pneg %p860_p1  ;;  %p867_p6 = por %p866_p2, %p865_p9 }
  0x51   : > { %p868_p13 = pnand %p867_p6, %p861_p8 }
  0x53   : > { %871 = shalt.err (!%p868_p13)
}
  0x54   : > { %740 = dma.hbm_to_vmem [thread:$0]  (!%p1132_p0), %s1190_s9, 128, %s1193_s10, %s194_s23  }
  0x55   : > { %s234_s19 = scalar_lea.vmem [#allocation7], %s1125_s6  ;;  %s872_s14 = scalar_lea.hbm %s1199_s5, 128 }
  0x56   : > { %s241_s29 = sshll.u32 %s234_s19, 4  ;;  %p873_p11 = scmp.ne.s32.totalorder %s1199_s5, %s872_s14  ;;  %s242_s29 = int_to_ptr.vmem [resolvable:$true] %s241_s29 }
  0x57   : > { %s877_s26 = scalar_lea.hbm %s1356_s2, 256  ;;  %p878_p5 = scmp.lt.u32.totalorder %s1199_s5, %s1356_s2 }
  0x58   : > { %p875_p2 = pnand %p873_p11, %p1154_p4  ;;  %p879_p7 = scmp.lt.u32.totalorder %s877_s26, %s872_s14 }
  0x59   : > { %p881_p12 = scmp.lt.u32.totalorder %s872_s14, %s1199_s5 }
  0x5a   : > { %p876_p3 = pneg %p875_p2  ;;  %p880_p10 = por %p879_p7, %p878_p5 }
  0x5c   : > { %p882_p1 = por %p881_p12, %p880_p10 }
  0x5e   : > { %p883_p8 = pnand %p882_p1, %p876_p3 }
  0x60   : > { %886 = shalt.err (!%p883_p8)
}
  0x61   : > { %s887_s23 = scalar_lea.vmem %s242_s29, 128  ;;  %s1024_s6 = smov [#allocation7]  }
  0x62   : > { %p888_p9 = scmp.ne.s32.totalorder %s242_s29, %s887_s23  ;;  %s892_s9 = sshll.u32 %s1024_s6, 4  ;;  %s893_s9 = int_to_ptr.vmem [resolvable:$false] %s892_s9 }
  0x63   : > { %s894_s10 = scalar_lea.vmem %s893_s9, 256  ;;  %p895_p11 = scmp.lt.s32.totalorder %s242_s29, %s893_s9 }
  0x64   : > { %p890_p6 = pnand %p888_p9, %p1154_p4  ;;  %p896_p2 = scmp.lt.s32.totalorder %s894_s10, %s887_s23 }
  0x66   : > { %p891_p13 = pneg %p890_p6  ;;  %p897_p0 = por %p896_p2, %p895_p11 }
  0x68   : > { %p898_p5 = pnand %p897_p0, %p891_p13 }
  0x6a   : > { %901 = shalt.err (!%p898_p5)
}
  0x6b   : > { %p1383_p7 = scmp.ne.s32.totalorder %s1376_s8, 0  ;;  %p1384_p3 = scmp.ne.s32.totalorder %s1381_s24, 0 }
  0x6c   : > { %s1246_s25 = sand.u32 (!%p1384_p3), 1, %s1004_s16   ;;  %p1385_p0 = scmp.ne.s32.totalorder (!%p1384_p3), %s1372_s27, 0 }
  0x6d   : > { %746 = dma.hbm_to_vmem [thread:$0]  (!%p1383_p7), %s1199_s5, 128, %s242_s29, %s1148_s22  }
  0x6e   : > { %250 = sbr.rel (%p1384_p3) target bundleno = 1038 (0x40e), region = 32  ;;  %s1249_s12 = sshll.u32 (!%p1384_p3), %s1246_s25, 3 }
  0x6f   : > { %s253_s20 = scalar_lea.sflag (!%p1384_p3), [#allocation3], %s1246_s25  ;;  %s256_s19 = scalar_lea.vmem (!%p1384_p3), [#allocation2], %s1249_s12 }
  0x75   : > { %983 = dma.done.wait (%p1385_p0), %s253_s20, 128  }
  0x76   : > { %985 = vsyncadd (%p1385_p0), %s253_s20, 4294967168  ;;  %s261_s8 = sand.u32 1, %s1085_s21   ;;  %s265_s24 = scalar_lea.vmem [#allocation5], %s1249_s12 }
  0x77   : > { %s262_s22 = scalar_lea.sflag [#allocation6], %s261_s8 }
  0x78   : > { %987 = dma.done.wait (%p1385_p0), %s262_s22, 256  }
  0x79   : > { %989 = vsyncadd (%p1385_p0), %s262_s22, 4294967040  ;;  %v314_v0 = vld [vmem:[%s265_s24] sm:$0xff]  ;;  %vm316_vm0 = vcmask 261120   ;;  %v1025_v3 = vmov 0.0   ;;  %vm1026_vm1 = vmmov 0   ;;  %v323_v6 = vld [vmem:[%s256_s19] sm:$0xff]  ;;  %v402_v10 = vlaneseq }
  0x7a   : > { %v315_v1 = vmul.f32 %v314_v0, %v314_v0  ;;  %717 = vmatprep.subr.mxu0 %v1025_v3  ;;  %722 = vmatprep.subr.mxu1 %v1025_v3  ;;  %v324_v9 = vmul.f32 0.17677669, %v323_v6  ;;  %vm410_vm3 = vcmask 64512   ;;  %s274_s21 = scalar_lea.vmem [#allocation7], %s1249_s12  ;;  %s313_s27 = scalar_lea.vmem [#allocation9], %s1249_s12 }
  0x7b   : > { %719 = vmatprep.mubr.msk.f32.mxu0 %vm1026_vm1, %v1025_v3  ;;  %724 = vmatprep.mubr.msk.f32.mxu1 %vm1026_vm1, %v1025_v3  ;;  %v403_v11 = vshrl.u32 %v402_v10, 7  ;;  %v407_v12 = vand.u32 127, %v402_v10  ;;  %v422_v22 = vld [vmem:[%s274_s21] sm:$0xff]  ;;  %s709_s5 = sshll.u32 %s1012_s18, 7  ;;  %s532_s13 = sshll.u32 %s313_s27, 4  ;;  %s533_s13 = int_to_ptr.vmem [resolvable:$true] %s532_s13 }
  0x7c   : > { %v317_v2 = vsel %vm316_vm0, %v315_v1, 0.0  ;;  %723 = vmatpush3.msra.mxu1 %v422_v22  ;;  %s1278_s11 = scalar_lea.hbm %s1358_s4, %s709_s5  ;;  %s504_s26 = scalar_lea.sflag [#allocation10], %s1246_s25 }
  0x7d   : > { %318 = vadd.xlane.f32.xlu0 %v317_v2  ;;  %vm408_vm2 = vcmp.eq.s32.totalorder %v403_v11, %v407_v12  ;;  %s902_s1 = scalar_lea.vmem %s533_s13, 128  ;;  %p1386_p10 = scmp.ne.s32.totalorder %s1373_s28, 0 }
  0x7e   : > { %p903_p4 = scmp.ne.s32.totalorder %s533_s13, %s902_s1  ;;  %s1027_s7 = smov [#allocation9]  }
  0x7f   : > { %s906_s23 = sshll.u32 %s1027_s7, 4  ;;  %s907_s23 = int_to_ptr.vmem [resolvable:$false] %s906_s23 }
  0x80   : > { %p904_p12 = pnand %p903_p4, %p1386_p10  ;;  %s908_s6 = scalar_lea.vmem %s907_s23, 256 }
  0x81   : > { %p909_p8 = scmp.lt.s32.totalorder %s533_s13, %s907_s23  ;;  %p910_p9 = scmp.lt.s32.totalorder %s908_s6, %s902_s1 }
  0x82   : > { %p905_p1 = pneg %p904_p12 }
  0x83   : > { %p911_p6 = por %p910_p9, %p909_p8 }
  0x85   : > { %p912_p13 = pnand %p911_p6, %p905_p1 }
 0x10a   : > { %v319_v4 = vpop.xlane.xlu0 %318 }
 0x10b   : > { %v320_v5 = vmax.f32 %v319_v4, 1e-24 }
 0x10d   : > { %806 = vrsqrt.f32 %v320_v5 }
 0x117   : > { %v807_v7 = vpop.eup %806 }
 0x118   : > { %v322_v8 = vmul.f32 %v807_v7, %v314_v0 }
 0x11a   : > { %718 = vmatpush3.xpose.msk.msra.mxu0 %vm316_vm0, %v322_v8 }
 0x11d   : > { %720 = vmatmul.mubr.msk.f32.vlgmr.msra.gmra.mrb[0].mxu0 %vm316_vm0, %v324_v9 }
 0x1f0   : > { %v397_v13 = vpop.f32.mrb[0].mxu0 }
 0x1f1   : > { %v409_v14 = vsel %vm408_vm2, -50000.0, %v397_v13  ;;  %v721_v15 = vpop.f32.mrb[1].mxu0 }
 0x1f2   : > { %v411_v16 = vsel %vm410_vm3, %v409_v14, -inf }
 0x1f3   : > { %412 = vmax.xlane.f32.xlu0 %v411_v16 }
 0x280   : > { %v413_v17 = vpop.xlane.xlu0 %412 }
 0x281   : > { %v414_v18 = vsub.f32 %v409_v14, %v413_v17 }
 0x283   : > { %v415_v19 = vmul.f32 1.442695, %v414_v18 }
 0x285   : > { %808 = vpow2.f32 %v415_v19 }
 0x28f   : > { %v809_v20 = vpop.eup %808 }
 0x290   : > { %v417_v21 = vsel %vm410_vm3, %v809_v20, 0.0 }
 0x291   : > { %418 = vadd.xlane.f32.xlu1 %v417_v21 }
 0x31e   : > { %v419_v23 = vpop.xlane.xlu1 %418 }
 0x31f   : > { %810 = vrcp.f32 %v419_v23 }
 0x329   : > { %v811_v24 = vpop.eup %810 }
 0x32a   : > { %v421_v25 = vmul.f32 %v811_v24, %v809_v20 }
 0x32c   : > { %725 = vmatmul.mubr.msk.f32.vlgmr.msra.gmra.mrb[0].mxu1 %vm410_vm3, %v421_v25  ;;  %497 = vst.msk [vmem:[%s313_s27] sm:$0xff] %vm410_vm3, %v421_v25 }
 0x32d   : > { %915 = shalt.err (!%p912_p13)
}
 0x32e   : > { %s916_s9 = scalar_lea.hbm %s1278_s11, 128  ;;  %s920_s19 = scalar_lea.hbm %s1358_s4, 256 }
 0x32f   : > { %p917_p11 = scmp.ne.s32.totalorder %s1278_s11, %s916_s9  ;;  %p921_p7 = scmp.lt.u32.totalorder %s1278_s11, %s1358_s4 }
 0x330   : > { %p922_p3 = scmp.lt.u32.totalorder %s920_s19, %s916_s9  ;;  %p924_p4 = scmp.lt.u32.totalorder %s916_s9, %s1278_s11 }
 0x331   : > { %p918_p2 = pnand %p917_p11, %p1386_p10 }
 0x332   : > { %p923_p0 = por %p922_p3, %p921_p7 }
 0x333   : > { %p919_p5 = pneg %p918_p2 }
 0x334   : > { %p925_p12 = por %p924_p4, %p923_p0 }
 0x336   : > { %p926_p1 = pnand %p925_p12, %p919_p5 }
 0x338   : > { %929 = shalt.err (!%p926_p1)
}
 0x339   : > { %734 = dma.vmem_to_hbm [thread:$0]  (%p1386_p10), %s533_s13, 128, %s1278_s11, %s504_s26  }
 0x33a   : > { %s306_s24 = scalar_lea.vmem [#allocation8], %s1249_s12  ;;  %s1304_s14 = scalar_lea.hbm %s1357_s3, %s709_s5 }
 0x33b   : > { %s518_s21 = sshll.u32 %s306_s24, 4  ;;  %s499_s1 = scalar_lea.sflag [#allocation4], %s1246_s25  ;;  %s1306_s21 = int_to_ptr.vmem [resolvable:$true] %s518_s21 }
 0x33c   : > { %s930_s7 = scalar_lea.vmem %s1306_s21, 128  ;;  %s1028_s18 = smov [#allocation8]  }
 0x33d   : > { %p931_p8 = scmp.ne.s32.totalorder %s1306_s21, %s930_s7  ;;  %s934_s12 = sshll.u32 %s1028_s18, 4  ;;  %s935_s12 = int_to_ptr.vmem [resolvable:$false] %s934_s12 }
 0x33e   : > { %s936_s5 = scalar_lea.vmem %s935_s12, 256  ;;  %p937_p13 = scmp.lt.s32.totalorder %s1306_s21, %s935_s12 }
 0x33f   : > { %p932_p9 = pnand %p931_p8, %p1386_p10  ;;  %p938_p11 = scmp.lt.s32.totalorder %s936_s5, %s930_s7 }
 0x341   : > { %p933_p6 = pneg %p932_p9  ;;  %p939_p2 = por %p938_p11, %p937_p13 }
 0x343   : > { %p940_p5 = pnand %p939_p2, %p933_p6 }
 0x3ff   : > { %v492_v26 = vpop.f32.mrb[0].mxu1 }
 0x400   : > { %496 = vst.msk [vmem:[%s306_s24] sm:$0xff] %vm316_vm0, %v492_v26  ;;  %v726_v27 = vpop.f32.mrb[1].mxu1 }
 0x401   : > { %943 = shalt.err (!%p940_p5)
}
 0x402   : > { %s944_s25 = scalar_lea.hbm %s1304_s14, 128  ;;  %s948_s26 = scalar_lea.hbm %s1357_s3, 256 }
 0x403   : > { %p945_p7 = scmp.ne.s32.totalorder %s1304_s14, %s944_s25  ;;  %p949_p4 = scmp.lt.u32.totalorder %s1304_s14, %s1357_s3 }
 0x404   : > { %p950_p12 = scmp.lt.u32.totalorder %s948_s26, %s944_s25  ;;  %p952_p8 = scmp.lt.u32.totalorder %s944_s25, %s1304_s14 }
 0x405   : > { %p946_p3 = pnand %p945_p7, %p1386_p10 }
 0x406   : > { %p951_p1 = por %p950_p12, %p949_p4 }
 0x407   : > { %p947_p0 = pneg %p946_p3 }
 0x408   : > { %p953_p9 = por %p952_p8, %p951_p1 }
 0x40a   : > { %p954_p6 = pnand %p953_p9, %p947_p0 }
 0x40c   : > { %957 = shalt.err (!%p954_p6)
}
 0x40d   : > { %733 = dma.vmem_to_hbm [thread:$0]  (%p1386_p10), %s1306_s21, 128, %s1304_s14, %s499_s1  }
 0x40e PF: > { %s1387_s9 = sld [smem:[#allocation16_spill]]  ;;  %s544_s10 = sand.u32 1, %s1000_s15  }
 0x40f   : > { %p1388_p13 = scmp.ne.s32.totalorder %s1375_s30, 0  ;;  %s545_s20 = scalar_lea.sflag [#allocation4], %s544_s10 }
 0x414   : > { %p1389_p11 = scmp.ge.s32.totalorder %s1387_s9, 2 }
 0x416   : > { %p748_p2 = pnand %p1389_p11, %p1388_p13 }
 0x418   : > { %991 = dma.done.wait (!%p748_p2), %s545_s20, 128  }
 0x419   : > { %993 = vsyncadd (!%p748_p2), %s545_s20, 4294967168  ;;  %s554_s19 = scalar_lea.sflag [#allocation10], %s544_s10 }
 0x41a   : > { %995 = dma.done.wait (!%p748_p2), %s554_s19, 128  }
 0x41b   : > { %997 = vsyncadd (!%p748_p2), %s554_s19, 4294967168  ;;  %s27_s20 = sadd.s32 1, %s1387_s9   ;;  %s1390_s28 = sld [smem:[#allocation18_spill]] }
 0x41c   : > { %p24_p5 = scmp.ge.s32.totalorder %s27_s20, 4   ;;  %s1391_s18 = sld [smem:[#allocation15_spill]] }
 0x41d   : > { %s1392_s19 = sld [smem:[#allocation17_spill]]  ;;  %s1393_s15 = smov %s1004_s16 }
 0x41e   : > { %s1394_s16 = smov %s1008_s17  ;;  %26 = sbr.rel (!%p24_p5) target bundleno = 12 (0xc), region = 118 }
 0x421   : > { %s1395_s17 = smov %s1390_s28 }
 0x425   :  { %559 = vsyncpa [#allocation3], 1 }
 0x426   :  { %561 = vsyncpa [#allocation3 + $0x1], 1 }
 0x427   :  { %562 = vsyncpa [#allocation6], 1 }
 0x428   :  { %564 = vsyncpa [#allocation6 + $0x1], 1 }
 0x429   :  { %565 = vsyncpa [#allocation4], 1 }
 0x42a   :  { %567 = vsyncpa [#allocation4 + $0x1], 1 }
 0x42b   :  { %568 = vsyncpa [#allocation10], 1 }
 0x42c   :  { %570 = vsyncpa [#allocation10 + $0x1], 1 }

</bundles_post_ra>
